<compile_context>
chip_gen: v7x
topology: tpu7x:2x2x1
jax: 0.10.0
libtpu: 0.0.40
codegen_flags: <defaults>
</compile_context>

<pallas_src>
import math

import jax
import jax.numpy as jnp
from jax.experimental import pallas as pl
from jax.experimental.pallas import tpu as pltpu


_GELU_CONST = math.sqrt(2.0 / math.pi)
# 0.5 * x * (1 + tanh(z)) == x * sigmoid(2 z); fold the 2 into the constants.
_K1 = 2.0 * _GELU_CONST
_K2 = 2.0 * _GELU_CONST * 0.044715

_TARGET_BLOCK_BYTES = 4 << 20   # ~4 MiB blocks: per-step overhead <1% of HBM time
_MAX_BLOCK_BYTES = 6 << 20      # cap after even-count nudging (4 bufs <= 24 MiB)
_MIN_SPLIT_BYTES = 1 << 20      # below this a single block is latency-optimal
_VMEM_LIMIT_BYTES = 32 << 20    # explicit: v5e default scoped VMEM is only 16 MiB
_LANE_CANDIDATES = (4096, 2048, 1024, 512, 256, 128)


def _gelu_kernel(x_ref, o_ref):
    x = x_ref[...]
    # bf16 inputs: compute natively in bf16 (v6e/v7x bf16 VPU/EUP; Mosaic
    # handles v5e). Everything else (f32, f16, ...) computes in f32.
    cdt = jnp.bfloat16 if x.dtype == jnp.bfloat16 else jnp.float32
    xc = x.astype(cdt)
    # Sigmoid form of the tanh-GELU: y = x * sigmoid(k1*x + k2*x^3).
    # Python-float constants stay weakly typed -> no up/down casts for bf16.
    z = _K1 * xc + _K2 * (xc * xc * xc)
    y = xc * jax.nn.sigmoid(z)
    o_ref[...] = y.astype(o_ref.dtype)


def _native_sublane(dtype):
    """Native packed sublane tile: 8 for 4-byte, 16 for 2-byte, 32 for 1-byte."""
    itemsize = jnp.dtype(dtype).itemsize
    return max(8, 32 // itemsize)


def _round_up(v, m):
    return ((v + m - 1) // m) * m


def _pick_tile_rows(rows, row_bytes, sublane):
    """Row tile (multiple of the native sublane tile) giving large, even-count
    blocks. Partial edge blocks are legal (Pallas masks them)."""
    total = rows * row_bytes
    if rows <= sublane or total <= _MIN_SPLIT_BYTES:
        return rows  # single full-dim block (always legal)
    # Target an even block count so v7x's two TensorCores stay balanced.
    nblk = pl.cdiv(total, _TARGET_BLOCK_BYTES)
    nblk = max(2, nblk + (nblk % 2))
    tile = _round_up(pl.cdiv(rows, nblk), sublane)
    tile = min(tile, _round_up(rows, sublane))
    # Rounding the tile up can push the count back to odd; nudge the tile up
    # (bigger blocks are fine) until the count is even, staying under the cap.
    for _ in range(16):
        count = pl.cdiv(rows, tile)
        if count <= 1 or count % 2 == 0:
            break
        if (tile + sublane) * row_bytes > _MAX_BLOCK_BYTES:
            break
        tile += sublane
    return tile


def _run_2d(x2d):
    rows, cols = x2d.shape
    dtype = x2d.dtype
    itemsize = jnp.dtype(dtype).itemsize
    sublane = _native_sublane(dtype)

    # Lane (last-dim) tiling: full width when it fits the budget, otherwise a
    # 128-multiple tile (the ragged edge block is masked automatically).
    if cols * itemsize <= _TARGET_BLOCK_BYTES:
        tile_cols = cols
    else:
        tile_cols = max(128, (_TARGET_BLOCK_BYTES // itemsize) // 128 * 128)

    tile_rows = _pick_tile_rows(rows, tile_cols * itemsize, sublane)
    grid = (pl.cdiv(rows, tile_rows), pl.cdiv(cols, tile_cols))

    n = rows * cols
    cost = pl.CostEstimate(
        flops=8 * n, transcendentals=n, bytes_accessed=2 * n * itemsize)

    return pl.pallas_call(
        _gelu_kernel,
        out_shape=jax.ShapeDtypeStruct((rows, cols), dtype),
        grid_spec=pltpu.PrefetchScalarGridSpec(
            num_scalar_prefetch=0,
            grid=grid,
            in_specs=[pl.BlockSpec((tile_rows, tile_cols), lambda i, j: (i, j))],
            out_specs=pl.BlockSpec((tile_rows, tile_cols), lambda i, j: (i, j)),
        ),
        compiler_params=pltpu.CompilerParams(
            dimension_semantics=("parallel", "parallel"),
            vmem_limit_bytes=_VMEM_LIMIT_BYTES,
        ),
        cost_estimate=cost,
    )(x2d)


def gelu_pallas(x):
    """Elementwise tanh-GELU (BERT/GPT formulation). Any shape / float dtype."""
    n = x.size
    if n == 0:
        return x
    orig_shape = x.shape
    sublane = _native_sublane(x.dtype)

    # Preferred view: a lane-dense, padding-free (rows, cols) factorization of
    # the flat size with cols a multiple of 128 (reshape of a contiguous array
    # is free). Prefer rows aligned to the native sublane tile, then rows that
    # at least fill a packed tile, then any 128-multiple factorization.
    best = good = anyc = None
    for c in _LANE_CANDIDATES:
        if n % c != 0:
            continue
        r = n // c
        if best is None and r % sublane == 0:
            best = c
        if good is None and r >= sublane:
            good = c
        if anyc is None:
            anyc = c
    cols = best if best is not None else (good if good is not None else anyc)

    if cols is not None:
        x2d = x.reshape(n // cols, cols)
    else:
        # Ragged flat size: keep a zero-copy 2-D view (merge leading dims,
        # trailing dim unchanged) and let Pallas mask the partial edge blocks.
        # No wrapper-side pad/slice passes over HBM.
        # TODO(synk): if the trailing dim is both ragged and tiny on a huge
        # array, stores are lane-sparse; a manual masked-DMA repack would help.
        last = orig_shape[-1] if x.ndim >= 1 else 1
        x2d = x.reshape(-1, last)

    out2d = _run_2d(x2d)
    return out2d.reshape(orig_shape)


def gelu_ref(x):
    return 0.5 * x * (1.0 + jnp.tanh(_GELU_CONST * (x + 0.044715 * jnp.power(x, 3))))


if __name__ == "__main__":
    key = jax.random.PRNGKey(0)
    k1, k2, k3 = jax.random.split(key, 3)
    gelu = jax.jit(gelu_pallas)

    # 1) f32, activation-like 4-D shape (matches the module's typical use).
    x_f32 = jax.random.normal(k1, (2, 4, 16, 16), dtype=jnp.float32)
    out_f32 = jax.block_until_ready(gelu(x_f32))
    assert out_f32.shape == x_f32.shape and out_f32.dtype == x_f32.dtype
    assert jnp.max(jnp.abs(out_f32 - gelu_ref(x_f32))) < 3e-5

    # 2) bf16 path (native bf16 compute in-kernel).
    x_bf16 = jax.random.normal(k2, (2, 8, 16, 32), dtype=jnp.bfloat16)
    out_bf16 = jax.block_until_ready(gelu(x_bf16))
    assert out_bf16.shape == x_bf16.shape and out_bf16.dtype == jnp.bfloat16
    ref_bf16 = gelu_ref(x_bf16.astype(jnp.float32))
    assert jnp.max(jnp.abs(out_bf16.astype(jnp.float32) - ref_bf16)) < 8e-2

    # 3) Ragged flat size (not a multiple of 128) -> zero-copy masked-edge path.
    x_rag = jax.random.normal(k3, (13, 37), dtype=jnp.float32)
    out_rag = jax.block_until_ready(gelu(x_rag))
    assert out_rag.shape == x_rag.shape and out_rag.dtype == x_rag.dtype
    assert jnp.max(jnp.abs(out_rag - gelu_ref(x_rag))) < 3e-5

    print("KERNEL_OK")
</pallas_src>

<mosaic_0001>
module attributes {stable_mosaic.version = 11 : i64} {
  func.func @_gelu_kernel(%arg0: i32, %arg1: i32, %arg2: memref<8x256xf32, #tpu.memory_space<vmem>>, %arg3: memref<8x256xf32, #tpu.memory_space<vmem>>) attributes {dimension_semantics = [#tpu.dimension_semantics<parallel>, #tpu.dimension_semantics<parallel>], iteration_bounds = array<i64: 1, 1>, scalar_prefetch = 0 : i64, scratch_operands = 0 : i64, tpu.core_type = #tpu.core_type<tc>, window_params = [{transform_indices = @transform_0, window_bounds = array<i64: 8, 256>}, {transform_indices = @transform_1, window_bounds = array<i64: 8, 256>}]} {
    %c0 = arith.constant 0 : index
    %c0_0 = arith.constant 0 : index
    %0 = vector.load %arg2[%c0, %c0_0] : memref<8x256xf32, #tpu.memory_space<vmem>>, vector<8x256xf32>
    %cst = arith.constant 1.59576917 : f32
    %1 = vector.broadcast %cst : f32 to vector<8x256xf32>
    %2 = arith.mulf %1, %0 : vector<8x256xf32>
    %3 = arith.mulf %0, %0 : vector<8x256xf32>
    %4 = arith.mulf %3, %0 : vector<8x256xf32>
    %cst_1 = arith.constant 0.0713548139 : f32
    %5 = vector.broadcast %cst_1 : f32 to vector<8x256xf32>
    %6 = arith.mulf %5, %4 : vector<8x256xf32>
    %7 = arith.addf %2, %6 : vector<8x256xf32>
    %8 = arith.negf %7 : vector<8x256xf32>
    %9 = math.exp %8 : vector<8x256xf32>
    %cst_2 = arith.constant 1.000000e+00 : f32
    %10 = vector.broadcast %cst_2 : f32 to vector<8x256xf32>
    %11 = arith.addf %10, %9 : vector<8x256xf32>
    %12 = arith.divf %10, %11 : vector<8x256xf32>
    %13 = arith.mulf %0, %12 : vector<8x256xf32>
    %c0_3 = arith.constant 0 : index
    %c0_4 = arith.constant 0 : index
    %14 = vector.load %arg3[%c0_3, %c0_4] : memref<8x256xf32, #tpu.memory_space<vmem>>, vector<8x256xf32>
    tpu.vector_store %arg3[%c0_3, %c0_4], %13 {strides = array<i32>} : memref<8x256xf32, #tpu.memory_space<vmem>>, vector<8x256xf32>,
    return
  }
  func.func @transform_0(%arg0: i32, %arg1: i32) -> (i32, i32) {
    %c0_i32 = arith.constant 0 : i32
    return %arg0, %arg1 : i32, i32
  }
  func.func @transform_1(%arg0: i32, %arg1: i32) -> (i32, i32) {
    %c0_i32 = arith.constant 0 : i32
    return %arg0, %arg1 : i32, i32
  }
}

</mosaic_0001>

<bundles_post_ra>
// kernel: gelu_pallas.1
= control target key start
LH: loop header
LB: loop body
LE: loop exit
PB: predicated region body
PF: predicated region fallthrough
CT: control target
= control target key end

     0   :  { %s72_s0 = inlined_call_operand.vmem [shape: f32[8,256], index: 0, kind: input, shape index: {}]   ;;  %s73_s1 = inlined_call_operand.vmem [shape: f32[8,256], index: 1, kind: output, shape index: {}]  }
   0x1   :  { %v8_v0 = vld [vmem:[%s72_s0] sm:$0xff]  ;;  %v9_v1 = vld [vmem:[%s72_s0 + $0x8] sm:$0xff] }
   0x2   :  { %v12_v2 = vmul.f32 %v8_v0, %v8_v0  ;;  %v13_v3 = vmul.f32 %v9_v1, %v9_v1  ;;  %v10_v4 = vmul.f32 1.5957692, %v8_v0  ;;  %v11_v6 = vmul.f32 1.5957692, %v9_v1 }
   0x4   :  { %v14_v5 = vmul.f32 %v12_v2, %v8_v0  ;;  %v15_v7 = vmul.f32 %v13_v3, %v9_v1 }
   0x6   :  { %v16_v8 = vmul.f32 0.071354814, %v14_v5  ;;  %v17_v9 = vmul.f32 0.071354814, %v15_v7 }
   0x8   :  { %v18_v10 = vadd.f32 %v16_v8, %v10_v4  ;;  %v19_v11 = vadd.f32 %v17_v9, %v11_v6 }
   0xa   :  { %v40_v12 = vmul.f32 -1.442695, %v18_v10  ;;  %v41_v13 = vmul.f32 -1.442695, %v19_v11 }
   0xc   :  { %42 = vpow2.f32 %v40_v12 }
   0xd   :  { %44 = vpow2.f32 %v41_v13 }
  0x16   :  { %v43_v14 = vpop.eup %42 }
  0x17   :  { %v45_v15 = vpop.eup %44  ;;  %v26_v16 = vadd.f32 1.0, %v43_v14 }
  0x18   :  { %v27_v17 = vadd.f32 1.0, %v45_v15 }
  0x19   :  { %46 = vrcp.f32 %v26_v16 }
  0x1a   :  { %48 = vrcp.f32 %v27_v17 }
  0x23   :  { %v47_v18 = vpop.eup %46 }
  0x24   :  { %v49_v19 = vpop.eup %48  ;;  %v32_v20 = vmul.f32 %v47_v18, %v8_v0 }
  0x25   :  { %v33_v21 = vmul.f32 %v49_v19, %v9_v1 }
  0x26   :  { %34 = vst [vmem:[%s73_s1] sm:$0xff] %v32_v20 }
  0x27   :  { %35 = vst [vmem:[%s73_s1 + $0x8] sm:$0xff] %v33_v21 }

</bundles_post_ra>
